<compile_context>
chip_gen: v6e
topology: v6e:2x2x1
jax: 0.10.0
libtpu: 0.0.40
codegen_flags: <defaults>
</compile_context>

<pallas_src>
import numpy as np
import jax
import jax.numpy as jnp
from jax.experimental import pallas as pl
from jax.experimental.pallas import tpu as pltpu


def _cubic_weight(x, a=-0.75):
    ax = np.abs(np.asarray(x, dtype=np.float64))
    w1 = ((a + 2.0) * ax - (a + 3.0)) * ax * ax + 1.0
    w2 = a * (((ax - 5.0) * ax + 8.0) * ax - 4.0)
    return np.where(ax <= 1.0, w1, np.where(ax < 2.0, w2, 0.0))


def _bicubic_matrix(in_size, out_size):
    """Interp matrix matching torchvision F.resize(BICUBIC, antialias=True).

    Upscale (scale<=1): torch upsample convention (align_corners=False,
    a=-0.75, replicate border) — antialias is a no-op when upscaling.
    Downscale: PIL-style antialiased bicubic (filter stretched by the scale,
    weights renormalized over in-range taps), as in torchvision's AA path.
    """
    W = np.zeros((out_size, in_size), dtype=np.float64)
    scale = in_size / out_size
    if scale <= 1.0:
        for i in range(out_size):
            src = (i + 0.5) * scale - 0.5
            base = int(np.floor(src))
            t = src - base
            taps = [base - 1, base, base + 1, base + 2]
            wts = _cubic_weight(np.array([t + 1.0, t, 1.0 - t, 2.0 - t]))
            for tap, w in zip(taps, wts):
                W[i, min(max(tap, 0), in_size - 1)] += w
    else:
        support = 2.0 * scale
        for i in range(out_size):
            center = (i + 0.5) * scale
            lo = max(int(center - support + 0.5), 0)
            hi = min(int(center + support + 0.5), in_size)
            taps = np.arange(lo, hi)
            wts = _cubic_weight((taps + 0.5 - center) / scale)
            wts = wts / wts.sum()
            for tap, w in zip(taps, wts):
                W[i, tap] += w
    return W.astype(np.float32)


def _center_crop_rows(w_full, resized, crop):
    """Fold torchvision center_crop into the interpolation-matrix rows.

    crop <= resized: slice rows.  crop > resized: torchvision zero-pads before
    cropping; all-zero weight rows reproduce that (epilogue bias = -mean/std).
    """
    if crop <= resized:
        top = int(round((resized - crop) / 2.0))
        return w_full[top:top + crop]
    pad_top = (crop - resized) // 2
    out = np.zeros((crop, w_full.shape[1]), dtype=w_full.dtype)
    out[pad_top:pad_top + resized] = w_full
    return out


def _preprocess_kernel(scale_ref, bias_ref, wh_ref, wwt_ref, img_ref, out_ref):
    B, C, H_in, W_in = img_ref.shape
    _, _, out_h, out_w = out_ref.shape

    x = img_ref[...]
    if x.dtype == jnp.uint8:          # trace-time constant; /255 folded into scale
        x = x.astype(jnp.float32)
    x = x.astype(jnp.bfloat16)        # bf16 matmuls, f32 accumulation below

    # W-contraction: single flattened matmul, M = B*C*H_in fills the MXU
    # (reshape only merges leading dims into the sublane axis).
    x2d = x.reshape(B * C * H_in, W_in)
    t = jnp.dot(x2d, wwt_ref[...],
                preferred_element_type=jnp.float32)          # (B*C*H_in, out_w)

    # H-contraction: single batched matmul over the B*C images/channels.
    t3 = t.reshape(B * C, H_in, out_w).astype(jnp.bfloat16)
    whb = jnp.broadcast_to(wh_ref[...], (B * C, out_h, H_in))
    r = jnp.einsum('bok,bkj->boj', whb, t3,
                   preferred_element_type=jnp.float32)       # (B*C, out_h, out_w)

    # Fused f32 normalize epilogue + one whole-block store (no per-channel writes).
    r = r * scale_ref[...] + bias_ref[...]
    out_ref[...] = r.reshape(B, C, out_h, out_w).astype(out_ref.dtype)
    # TODO(synk): for out_w < 128 a fully lane-flattened (B, C*out_h*out_w)
    # out_spec would make the vst stream dense, at the cost of an in-kernel
    # relayout; skipped to keep lowering simple and robust.


def image_classification_forward(img, *, crop_size, resize_size,
                                 mean=(0.485, 0.456, 0.406),
                                 std=(0.229, 0.224, 0.225)):
    N, C, H_in, W_in = img.shape
    wh_full = _bicubic_matrix(H_in, resize_size)
    ww_full = _bicubic_matrix(W_in, resize_size)
    if crop_size != 0:
        wh = _center_crop_rows(wh_full, resize_size, crop_size)
        ww = _center_crop_rows(ww_full, resize_size, crop_size)
        out_h = out_w = crop_size
    else:
        wh, ww = wh_full, ww_full
        out_h = out_w = resize_size

    # bf16 weights for the MXU (rows sum to 1, ~1e-3 relative error); the
    # column matrix is pre-transposed on the host (no in-kernel transpose).
    wh_d = jnp.asarray(wh, dtype=jnp.bfloat16)                            # (out_h, H_in)
    wwt_d = jnp.asarray(np.ascontiguousarray(ww.T), dtype=jnp.bfloat16)   # (W_in, out_w)

    mean_np = np.asarray(mean, dtype=np.float32)
    std_np = np.asarray(std, dtype=np.float32)
    if img.dtype == jnp.uint8:
        # convert_image_dtype's /255 folded into the epilogue scale; uint8 stays
        # uint8 in HBM (4x less read traffic than f32).
        # TODO(synk): torchvision rounds/clamps back to uint8 after a uint8
        # resize; that intermediate quantization is not modeled.
        scale_np = 1.0 / (255.0 * std_np)
    elif jnp.issubdtype(img.dtype, jnp.floating):
        # Keep the caller's float dtype (f32 or bf16) in HBM — no forced
        # astype(f32), which would add a full extra HBM pass.
        scale_np = 1.0 / std_np
    else:
        raise NotImplementedError(f"unsupported image dtype {img.dtype}")
    bias_np = -mean_np / std_np

    in_itemsize = img.dtype.itemsize
    # Per-image VMEM footprint: double-buffered in/out blocks + in-kernel
    # intermediates (bf16 image, f32+bf16 W-contraction result, broadcast row
    # matrix, f32 result slab).
    per_image = (C * H_in * W_in * in_itemsize * 2
                 + C * out_h * out_w * 4 * 2
                 + C * H_in * W_in * 2
                 + C * H_in * out_w * (4 + 2)
                 + C * out_h * H_in * 2
                 + C * out_h * out_w * 4)
    fixed = 2 * 2 * (out_h * H_in + W_in * out_w) + 1024
    budget = 40 * 2**20            # headroom under the 48 MiB v7x cap below
    max_b = 8
    B = 1
    for cand in range(1, min(N, max_b) + 1):
        if N % cand:
            continue
        if N >= 2 and N // cand < 2:   # keep grid >= 2 so both v7x TCs get work
            continue
        if fixed + cand * per_image <= budget:
            B = cand
    # TODO(synk): inputs so large that even B=1 misses the budget would need an
    # H-strip tiling path to stay inside v7x's 64 MiB VMEM.

    scale_d = jnp.asarray(np.tile(scale_np, B).reshape(B * C, 1, 1))
    bias_d = jnp.asarray(np.tile(bias_np, B).reshape(B * C, 1, 1))

    flops = 2 * N * C * (H_in * W_in * out_w + out_h * H_in * out_w)
    bytes_accessed = (N * C * H_in * W_in * in_itemsize
                      + N * C * out_h * out_w * 4
                      + 2 * (out_h * H_in + W_in * out_w))
    vmem_limit = int(min(48 * 2**20, max(32 * 2**20, 2 * (fixed + B * per_image))))

    return pl.pallas_call(
        _preprocess_kernel,
        out_shape=jax.ShapeDtypeStruct((N, C, out_h, out_w), jnp.float32),
        grid=(N // B,),
        in_specs=[
            pl.BlockSpec((B * C, 1, 1), lambda n: (0, 0, 0)),          # scale
            pl.BlockSpec((B * C, 1, 1), lambda n: (0, 0, 0)),          # bias
            pl.BlockSpec((out_h, H_in), lambda n: (0, 0)),             # W_h (cropped, bf16)
            pl.BlockSpec((W_in, out_w), lambda n: (0, 0)),             # W_w^T (cropped, bf16)
            pl.BlockSpec((B, C, H_in, W_in), lambda n: (n, 0, 0, 0)),  # B whole images
        ],
        out_specs=pl.BlockSpec((B, C, out_h, out_w), lambda n: (n, 0, 0, 0)),
        compiler_params=pltpu.CompilerParams(
            dimension_semantics=("parallel",),
            vmem_limit_bytes=vmem_limit),
        cost_estimate=pl.CostEstimate(flops=flops, transcendentals=0,
                                      bytes_accessed=bytes_accessed),
    )(scale_d, bias_d, wh_d, wwt_d, img)


if __name__ == "__main__":
    key = jax.random.PRNGKey(0)
    N, C, H, W = 2, 3, 16, 16
    resize_size, crop_size = 24, 8

    x_f32 = jax.random.uniform(key, (N, C, H, W), dtype=jnp.float32)  # float image in [0,1]
    x = x_f32.astype(jnp.bfloat16)   # bf16 in HBM: half the read traffic of f32

    out = image_classification_forward(x, crop_size=crop_size, resize_size=resize_size)
    out = jax.block_until_ready(out)

    # Pure-JAX f32 reference of the same math for a sanity check.
    xf = x.astype(jnp.float32)
    top = int(round((resize_size - crop_size) / 2.0))
    wh_ref = jnp.asarray(_bicubic_matrix(H, resize_size)[top:top + crop_size])
    ww_ref = jnp.asarray(_bicubic_matrix(W, resize_size)[top:top + crop_size])
    mean = jnp.asarray([0.485, 0.456, 0.406]).reshape(1, C, 1, 1)
    std = jnp.asarray([0.229, 0.224, 0.225]).reshape(1, C, 1, 1)
    ref = jnp.einsum('oh,nchw,pw->ncop', wh_ref, xf, ww_ref)
    ref = (ref - mean) / std

    assert out.shape == (N, C, crop_size, crop_size)
    assert out.dtype == jnp.float32
    err = float(jnp.max(jnp.abs(out - ref)))
    assert err < 5e-2, f"mismatch vs reference: max abs err {err}"

    print("KERNEL_OK")
</pallas_src>

<mosaic_0001>
module attributes {stable_mosaic.version = 11 : i64} {
  func.func @_preprocess_kernel(%arg0: i32, %arg1: memref<3x1x1xf32, #tpu.memory_space<vmem>>, %arg2: memref<3x1x1xf32, #tpu.memory_space<vmem>>, %arg3: memref<8x16xbf16, #tpu.memory_space<vmem>>, %arg4: memref<16x8xbf16, #tpu.memory_space<vmem>>, %arg5: memref<1x3x16x16xbf16, #tpu.memory_space<vmem>>, %arg6: memref<1x3x8x8xf32, #tpu.memory_space<vmem>>) attributes {dimension_semantics = [#tpu.dimension_semantics<parallel>], iteration_bounds = array<i64: 2>, scalar_prefetch = 0 : i64, scratch_operands = 0 : i64, tpu.core_type = #tpu.core_type<tc>, window_params = [{pipeline_mode = #tpu.pipeline_mode<synchronous>, transform_indices = @transform_0, window_bounds = array<i64: 3, 1, 1>}, {pipeline_mode = #tpu.pipeline_mode<synchronous>, transform_indices = @transform_1, window_bounds = array<i64: 3, 1, 1>}, {pipeline_mode = #tpu.pipeline_mode<synchronous>, transform_indices = @transform_2, window_bounds = array<i64: 8, 16>}, {pipeline_mode = #tpu.pipeline_mode<synchronous>, transform_indices = @transform_3, window_bounds = array<i64: 16, 8>}, {transform_indices = @transform_4, window_bounds = array<i64: 1, 3, 16, 16>}, {transform_indices = @transform_5, window_bounds = array<i64: 1, 3, 8, 8>}]} {
    %c0 = arith.constant 0 : index
    %c0_0 = arith.constant 0 : index
    %c0_1 = arith.constant 0 : index
    %c0_2 = arith.constant 0 : index
    %0 = vector.load %arg5[%c0, %c0_0, %c0_1, %c0_2] : memref<1x3x16x16xbf16, #tpu.memory_space<vmem>>, vector<1x3x16x16xbf16>
    %1 = vector.shape_cast %0 : vector<1x3x16x16xbf16> to vector<48x16xbf16>
    %c0_3 = arith.constant 0 : index
    %c0_4 = arith.constant 0 : index
    %2 = vector.load %arg4[%c0_3, %c0_4] : memref<16x8xbf16, #tpu.memory_space<vmem>>, vector<16x8xbf16>
    %cst = arith.constant dense<0.000000e+00> : vector<48x8xf32>
    %3 = tpu.matmul %1, %2, %cst {dimension_numbers = #tpu.dot_dimension_numbers<[1], [0], [0], [1], [0, 0, 1, 1], [], []>} : vector<48x16xbf16>, vector<16x8xbf16>, vector<48x8xf32> -> vector<48x8xf32>
    %4 = vector.shape_cast %3 : vector<48x8xf32> to vector<3x16x8xf32>
    %5 = arith.truncf %4 : vector<3x16x8xf32> to vector<3x16x8xbf16>
    %c0_5 = arith.constant 0 : index
    %c0_6 = arith.constant 0 : index
    %6 = vector.load %arg3[%c0_5, %c0_6] : memref<8x16xbf16, #tpu.memory_space<vmem>>, vector<8x16xbf16>
    %7 = vector.shape_cast %6 : vector<8x16xbf16> to vector<1x8x16xbf16>
    %8 = vector.broadcast %7 : vector<1x8x16xbf16> to vector<3x8x16xbf16>
    "tpu.trace_start"() <{level = 10 : i32, message = "bok,bkj->boj"}> : () -> ()
    %cst_7 = arith.constant dense<0.000000e+00> : vector<3x8x8xf32>
    %9 = tpu.matmul %8, %5, %cst_7 {dimension_numbers = #tpu.dot_dimension_numbers<[2], [1], [1], [2], [0, 0, 0, 1, 1, 2], [0], [0]>} : vector<3x8x16xbf16>, vector<3x16x8xbf16>, vector<3x8x8xf32> -> vector<3x8x8xf32>
    "tpu.trace_stop"() : () -> ()
    %c0_8 = arith.constant 0 : index
    %c0_9 = arith.constant 0 : index
    %c0_10 = arith.constant 0 : index
    %10 = vector.load %arg1[%c0_8, %c0_9, %c0_10] : memref<3x1x1xf32, #tpu.memory_space<vmem>>, vector<3x1x1xf32>
    %11 = vector.broadcast %10 : vector<3x1x1xf32> to vector<3x8x8xf32>
    %12 = arith.mulf %9, %11 : vector<3x8x8xf32>
    %c0_11 = arith.constant 0 : index
    %c0_12 = arith.constant 0 : index
    %c0_13 = arith.constant 0 : index
    %13 = vector.load %arg2[%c0_11, %c0_12, %c0_13] : memref<3x1x1xf32, #tpu.memory_space<vmem>>, vector<3x1x1xf32>
    %14 = vector.broadcast %13 : vector<3x1x1xf32> to vector<3x8x8xf32>
    %15 = arith.addf %12, %14 : vector<3x8x8xf32>
    %16 = vector.shape_cast %15 : vector<3x8x8xf32> to vector<1x3x8x8xf32>
    %c0_14 = arith.constant 0 : index
    %c0_15 = arith.constant 0 : index
    %c0_16 = arith.constant 0 : index
    %c0_17 = arith.constant 0 : index
    %17 = vector.load %arg6[%c0_14, %c0_15, %c0_16, %c0_17] : memref<1x3x8x8xf32, #tpu.memory_space<vmem>>, vector<1x3x8x8xf32>
    tpu.vector_store %arg6[%c0_14, %c0_15, %c0_16, %c0_17], %16 {strides = array<i32>} : memref<1x3x8x8xf32, #tpu.memory_space<vmem>>, vector<1x3x8x8xf32>,
    return
  }
  func.func @transform_0(%arg0: i32) -> (i32, i32, i32) {
    %c0_i32 = arith.constant 0 : i32
    %c0_i32_0 = arith.constant 0 : i32
    %c0_i32_1 = arith.constant 0 : i32
    %c0_i32_2 = arith.constant 0 : i32
    return %c0_i32, %c0_i32_0, %c0_i32_1 : i32, i32, i32
  }
  func.func @transform_1(%arg0: i32) -> (i32, i32, i32) {
    %c0_i32 = arith.constant 0 : i32
    %c0_i32_0 = arith.constant 0 : i32
    %c0_i32_1 = arith.constant 0 : i32
    %c0_i32_2 = arith.constant 0 : i32
    return %c0_i32, %c0_i32_0, %c0_i32_1 : i32, i32, i32
  }
  func.func @transform_2(%arg0: i32) -> (i32, i32) {
    %c0_i32 = arith.constant 0 : i32
    %c0_i32_0 = arith.constant 0 : i32
    %c0_i32_1 = arith.constant 0 : i32
    return %c0_i32, %c0_i32_0 : i32, i32
  }
  func.func @transform_3(%arg0: i32) -> (i32, i32) {
    %c0_i32 = arith.constant 0 : i32
    %c0_i32_0 = arith.constant 0 : i32
    %c0_i32_1 = arith.constant 0 : i32
    return %c0_i32, %c0_i32_0 : i32, i32
  }
  func.func @transform_4(%arg0: i32) -> (i32, i32, i32, i32) {
    %c0_i32 = arith.constant 0 : i32
    %c0_i32_0 = arith.constant 0 : i32
    %c0_i32_1 = arith.constant 0 : i32
    %c0_i32_2 = arith.constant 0 : i32
    return %arg0, %c0_i32, %c0_i32_0, %c0_i32_1 : i32, i32, i32, i32
  }
  func.func @transform_5(%arg0: i32) -> (i32, i32, i32, i32) {
    %c0_i32 = arith.constant 0 : i32
    %c0_i32_0 = arith.constant 0 : i32
    %c0_i32_1 = arith.constant 0 : i32
    %c0_i32_2 = arith.constant 0 : i32
    return %arg0, %c0_i32, %c0_i32_0, %c0_i32_1 : i32, i32, i32, i32
  }
}

</mosaic_0001>

<bundles_post_ra>
// kernel: tpu_custom_call.1
= control target key start
LH: loop header
LB: loop body
LE: loop exit
PB: predicated region body
PF: predicated region fallthrough
CT: control target
= control target key end

     0   :  { %10 = vsyncpa [#allocation3], 0  ;;  %s1077_s0 = inlined_call_operand.vmem [shape: f32[3,1,1], index: 0, kind: input, shape index: {}]   ;;  %s1078_s1 = inlined_call_operand.vmem [shape: f32[3,1,1], index: 1, kind: input, shape index: {}]   ;;  %s1079_s2 = inlined_call_operand.vmem [shape: bf16[8,16], index: 2, kind: input, shape index: {}]   ;;  %s1080_s3 = inlined_call_operand.vmem [shape: bf16[16,8], index: 3, kind: input, shape index: {}]   ;;  %s1081_s4 = inlined_call_operand.hbm [shape: bf16[2,3,16,16], index: 4, kind: input, shape index: {}]   ;;  %s1082_s5 = inlined_call_operand.hbm [shape: f32[2,3,8,8], index: 5, kind: output, shape index: {}]  }
   0x1   :  { %12 = vsyncpa [#allocation3 + $0x1], 0 }
   0x2   :  { %13 = vsyncpa [#allocation4], 0 }
   0x3   :  { %15 = vsyncpa [#allocation4 + $0x1], 0  ;;  %s886_s18 = smov 0   ;;  %s888_s19 = smov 0  }
   0x4   :  { %s890_s20 = smov 0   ;;  %s892_s21 = smov 0  }
   0x5 LB: > { %s907_s22 = sadd.s32 4294967295, %s845_s21   ;;  %s624_s23 = sadd.s32 4294967294, %s845_s21   ;;  %s845_s21 = sphi %s892_s21, %s1096_s21   ;;  %s841_s20 = sphi %s890_s20, %s1095_s20   ;;  %s837_s19 = sphi %s888_s19, %s1094_s19   ;;  %s833_s18 = sphi %s886_s18, %s1093_s18  }
   0x6   : > { %s911_s24 = sadd.s32 1, %s845_s21   ;;  %s112_s25 = sadd.s32 1, %s841_s20 }
   0x7   : > { %s109_s26 = ssub.s32 %s845_s21, %s911_s24  ;;  %p119_p0 = scmp.ne.s32.totalorder %s841_s20, %s837_s19 }
   0x8   : > { %p110_p1 = scmp.eq.s32.totalorder %s109_s26, 0  ;;  %p120_p2 = scmp.eq.s32.totalorder %s845_s21, 0 }
   0x9   : > { %p125_p3 = scmp.ne.s32.totalorder %s837_s19, %s833_s18  ;;  %p126_p4 = scmp.eq.s32.totalorder %s907_s22, 0 }
   0xa   : > { %s923_s27 = scalar_select %p110_p1, %s841_s20, %s112_s25  }
   0xb   : > { %p121_p5 = por %p120_p2, %p119_p0  ;;  %p925_p6 = por %p126_p4, %p125_p3 }
   0xc   : > { %p149_p7 = scmp.eq.s32.totalorder %s907_s22, 1  ;;  %p155_p8 = scmp.eq.s32.totalorder %s624_s23, 1 }
   0xd   : > { %s1085_s28 = scalar_select %p925_p6, 1, 0 }
   0xe   : > { %p706_p10 = scmp.lt.s32.totalorder %s845_s21, 2  ;;  %p932_p11 = por %p149_p7, %p119_p0 }
   0xf   : > { %p936_p12 = por %p155_p8, %p125_p3  ;;  %s187_s6 = sand.u32 1, %s841_s20  }
  0x10   : > { %s1086_s29 = scalar_select %p932_p11, 1, 0 }
  0x11   : > { %s1087_s30 = scalar_select %p936_p12, 1, 0 }
  0x12   : > { %s691_s7 = smul.u32 384, %s845_s21  ;;  %p947_p13 = pnand %p706_p10, %p121_p5 }
  0x13   : > { %s690_s8 = smul.u32 24, %s187_s6  ;;  %s953_s15 = scalar_lea.sflag [#allocation3], %s187_s6 }
  0x14   : > { %s945_s11 = scalar_lea.hbm %s1081_s4, %s691_s7  ;;  %p755_p1 = pneg %p947_p13 }
  0x15   : > { %s191_s13 = scalar_lea.vmem [#allocation2], %s690_s8  ;;  %s753_s16 = scalar_lea.hbm %s945_s11, 384 }
  0x16   : > { %s198_s14 = sshll.u32 %s191_s13, 4  ;;  %p754_p0 = scmp.ne.s32.totalorder %s945_s11, %s753_s16  ;;  %s951_s14 = int_to_ptr.vmem [resolvable:$true] %s198_s14 }
  0x17   : > { %s758_s25 = scalar_lea.hbm %s1081_s4, 768  ;;  %p759_p4 = scmp.lt.s32.totalorder %s945_s11, %s1081_s4 }
  0x18   : > { %p756_p2 = pnand %p755_p1, %p754_p0  ;;  %p760_p5 = scmp.lt.s32.totalorder %s758_s25, %s753_s16 }
  0x1a   : > { %p757_p3 = pneg %p756_p2  ;;  %p761_p7 = por %p760_p5, %p759_p4 }
  0x1c   : > { %p762_p8 = pnand %p761_p7, %p757_p3 }
  0x1e   : > { %765 = shalt.err (!%p762_p8)
}
  0x1f   : > { %s766_s6 = scalar_lea.vmem %s951_s14, 384  ;;  %s847_s8 = smov [#allocation2]  }
  0x20   : > { %p767_p10 = scmp.ne.s32.totalorder %s951_s14, %s766_s6  ;;  %s771_s9 = sshll.u32 %s847_s8, 4  ;;  %s772_s9 = int_to_ptr.vmem [resolvable:$false] %s771_s9 }
  0x21   : > { %s773_s10 = scalar_lea.vmem %s772_s9, 768  ;;  %p774_p2 = scmp.lt.s32.totalorder %s951_s14, %s772_s9 }
  0x22   : > { %p769_p9 = pnand %p767_p10, %p755_p1  ;;  %p775_p12 = scmp.lt.s32.totalorder %s773_s10, %s766_s6 }
  0x24   : > { %p770_p0 = pneg %p769_p9  ;;  %p776_p11 = por %p775_p12, %p774_p2 }
  0x26   : > { %p777_p6 = pnand %p776_p11, %p770_p0 }
  0x28   : > { %780 = shalt.err (!%p777_p6)
}
  0x29   : > { %s848_s13 = smov 64   ;;  %s849_s16 = smov 4  }
  0x2a   : > { %701 = dma.hbm_to_vmem [thread:$0]  (!%p947_p13), %s945_s11, 384, %s951_s14, %s953_s15, %s848_s13, %s848_s13, %s849_s16  }
  0x2b   : > { %p628_p9 = scmp.ge.s32.totalorder %s845_s21, 1  ;;  %p206_p1 = scmp.lt.s32.totalorder %s845_s21, 3 }
  0x2d   : > { %p207_p3 = pnand %p628_p9, %p206_p1 }
  0x2e   : > { %s977_s17 = sand.u32 (!%p207_p3), 1, %s837_s19   ;;  %p1089_p6 = scmp.ne.s32.totalorder (!%p207_p3), %s1085_s28, 0 }
  0x2f   : > { %210 = sbr.rel (%p207_p3) target bundleno = 489 (0x1e9), region = 40  ;;  %s213_s25 = scalar_lea.sflag (!%p207_p3), [#allocation3], %s977_s17 }
  0x30   : > { %s692_s23 = smul.u32 (!%p207_p3), 24, %s977_s17 }
  0x32   : > { %s216_s26 = scalar_lea.vmem (!%p207_p3), [#allocation2], %s692_s23 }
  0x34   : > { %824 = dma.done.wait (%p1089_p6), %s213_s25, 384  }
  0x35   : > { %826 = vsyncadd (%p1089_p6), %s213_s25, 4294966912  ;;  %v850_v0 = vmov 0.0   ;;  %vm851_vm0 = vmmov 0   ;;  %v749_v1 = vld [vmem:[%s1080_s3] sm:$0xff]   ;;  %vm273_vm1 = vcmask 130048   ;;  %v752_v4 = vld [vmem:[%s216_s26 + $0x10] sm:$0xff]  }
  0x36   : > { %658 = vmatprep.subr.bf16.mxu0 %v850_v0  ;;  %660 = vmatprep.mubr.msk.bf16.mxu0 %vm851_vm0, %v850_v0  ;;  %v750_v2 = vld [vmem:[%s216_s26] sm:$0xff]   ;;  %v751_v3 = vld [vmem:[%s216_s26 + $0x8] sm:$0xff]   ;;  %v852_v7 = vmov 0   ;;  %vm533_vm2 = vcmask 64512   ;;  %s242_s28 = scalar_lea.vmem [#allocation5], %s692_s23  ;;  %s693_s15 = smul.u32 384, %s907_s22 }
  0x37   : > { %672 = vmatprep.subr.bf16.mxu1 %v850_v0  ;;  %674 = vmatprep.mubr.msk.bf16.mxu1 %vm851_vm0, %v850_v0  ;;  %v641_v5 = vld [vmem:[%s1077_s0 + $0x2] ss:$0 sm:$0xff]  ;;  %v639_v6 = vld [vmem:[%s1077_s0] ss:$0 sm:$0xff]  ;;  %v640_v9 = vld [vmem:[%s1077_s0 + $0x1] ss:$0 sm:$0xff] }
  0x38   : > { %659 = vmatpush3.bf16.msra.mxu0 %v749_v1  ;;  %748 = vset.pattern.permute.xlu1 %v852_v7  ;;  %v642_v8 = vld [vmem:[%s1078_s1] ss:$0 sm:$0xff]  ;;  %v644_v10 = vld [vmem:[%s1078_s1 + $0x2] ss:$0 sm:$0xff]  ;;  %v643_v11 = vld [vmem:[%s1078_s1 + $0x1] ss:$0 sm:$0xff]  ;;  %s1033_s6 = scalar_lea.hbm %s1082_s5, %s693_s15 }
  0x39   : > { %747 = vset.pattern.permute.xlu0 %v852_v7  ;;  %494 = vperm.xlu1 %748, %v641_v5   ;;  %v343_v17 = vld [vmem:[%s1079_s2] sm:$0xf]  ;;  %s551_s14 = sshll.u32 %s242_s28, 4  ;;  %s538_s22 = scalar_lea.sflag [#allocation4], %s977_s17  ;;  %s1028_s14 = int_to_ptr.vmem [resolvable:$true] %s551_s14 }
  0x3a   : > { %486 = vperm.xlu0 %747, %v639_v6   ;;  %s781_s8 = scalar_lea.vmem %s1028_s14, 384  ;;  %p1090_p12 = scmp.ne.s32.totalorder %s1086_s29, 0 }
  0x3b   : > { %661 = vmatmul.mubr.msk.bf16.vlgmr.msra.gmra.mxu0 %vm273_vm1, %v750_v2  ;;  %p782_p11 = scmp.ne.s32.totalorder %s1028_s14, %s781_s8  ;;  %s853_s9 = smov [#allocation5]  }
  0x3c   : > { %664 = vmatprep.mubr.msk.bf16.mxu0 %vm851_vm0, %v850_v0  ;;  %s785_s10 = sshll.u32 %s853_s9, 4  ;;  %s786_s10 = int_to_ptr.vmem [resolvable:$false] %s785_s10 }
  0x3d   : > { %519 = vperm.xlu1 %748, %v642_v8   ;;  %p783_p13 = pnand %p782_p11, %p1090_p12  ;;  %s787_s13 = scalar_lea.vmem %s786_s10, 768 }
  0x3e   : > { %490 = vperm.xlu0 %747, %v640_v9   ;;  %p788_p5 = scmp.lt.s32.totalorder %s1028_s14, %s786_s10  ;;  %p789_p7 = scmp.lt.s32.totalorder %s787_s13, %s781_s8 }
  0x3f   : > { %p784_p4 = pneg %p783_p13 }
  0x40   : > { %p790_p8 = por %p789_p7, %p788_p5 }
  0x41   : > { %527 = vperm.xlu1 %748, %v644_v10  }
  0x42   : > { %523 = vperm.xlu0 %747, %v643_v11   ;;  %p791_p10 = pnand %p790_p8, %p784_p4 }
  0x43   : > { %665 = vmatmul.mubr.msk.bf16.gmra.mxu0 %vm273_vm1, %v751_v3 }
  0x44   : > { %668 = vmatprep.mubr.msk.bf16.mxu0 %vm851_vm0, %v850_v0 }
  0x4b   : > { %669 = vmatmul.mubr.msk.bf16.gmra.mxu0 %vm273_vm1, %v752_v4 }
  0xb4   : > { %v495_v28 = vpop.permute.xlu1 %494 }
  0xb5   : > { %v487_v29 = vpop.permute.xlu0 %486 }
  0xb8   : > { %v520_v31 = vpop.permute.xlu1 %519 }
  0xb9   : > { %v491_v34 = vpop.permute.xlu0 %490 }
  0xbc   : > { %v528_v47 = vpop.permute.xlu1 %527 }
  0xbd   : > { %v524_v39 = vpop.permute.xlu0 %523 }
  0xfb   : > { %v317_v12 = vpop.f32.mrf.mxu0 }
  0xfd   : > { %v662_v13 = vpop.f32.mrf.mxu0 }
  0xff   : > { %v320_v14 = vpop.f32.mrf.mxu0 }
 0x100   : > { %v340_v15 = vpack.c.bf16 %v320_v14, %v317_v12 }
 0x101   : > { %v663_v16 = vpop.f32.mrf.mxu0 }
 0x102   : > { %673 = vmatpush3.bf16.msra.mxu1 %v340_v15 }
 0x103   : > { %v325_v18 = vpop.f32.mrf.mxu0  ;;  %678 = vmatprep.subr.bf16.mxu1 %v850_v0 }
 0x105   : > { %v666_v19 = vpop.f32.mrf.mxu0  ;;  %675 = vmatmul.mubr.msk.bf16.vlgmr.msra.gmra.mxu1 %vm273_vm1, %v343_v17 }
 0x106   : > { %680 = vmatprep.mubr.msk.bf16.mxu1 %vm851_vm0, %v850_v0 }
 0x107   : > { %v328_v20 = vpop.f32.mrf.mxu0 }
 0x108   : > { %v341_v21 = vpack.c.bf16 %v328_v20, %v325_v18 }
 0x109   : > { %v667_v22 = vpop.f32.mrf.mxu0 }
 0x10a   : > { %679 = vmatpush3.bf16.msra.mxu1 %v341_v21 }
 0x10b   : > { %v333_v23 = vpop.f32.mrf.mxu0  ;;  %684 = vmatprep.subr.bf16.mxu1 %v850_v0 }
 0x10d   : > { %v670_v24 = vpop.f32.mrf.mxu0  ;;  %681 = vmatmul.mubr.msk.bf16.vlgmr.msra.gmra.mxu1 %vm273_vm1, %v343_v17 }
 0x10e   : > { %686 = vmatprep.mubr.msk.bf16.mxu1 %vm851_vm0, %v850_v0 }
 0x10f   : > { %v336_v25 = vpop.f32.mrf.mxu0 }
 0x110   : > { %v342_v26 = vpack.c.bf16 %v336_v25, %v333_v23 }
 0x111   : > { %v671_v27 = vpop.f32.mrf.mxu0 }
 0x112   : > { %685 = vmatpush3.bf16.msra.mxu1 %v342_v26 }
 0x115   : > { %687 = vmatmul.mubr.msk.bf16.vlgmr.msra.gmra.mxu1 %vm273_vm1, %v343_v17 }
 0x1c5   : > { %v381_v30 = vpop.f32.mrf.mxu1 }
 0x1c6   : > { %v497_v32 = vmul.f32 %v487_v29, %v381_v30 }
 0x1c7   : > { %v676_v33 = vpop.f32.mrf.mxu1 }
 0x1c8   : > { %v530_v35 = vadd.f32 %v520_v31, %v497_v32 }
 0x1c9   : > { %v384_v36 = vpop.f32.mrf.mxu1 }
 0x1ca   : > { %534 = vst.msk [vmem:[%s242_s28] sm:$0xff] %vm533_vm2, %v530_v35 }
 0x1cb   : > { %v677_v37 = vpop.f32.mrf.mxu1 }
 0x1cd   : > { %v421_v38 = vpop.f32.mrf.mxu1 }
 0x1ce   : > { %v498_v40 = vmul.f32 %v491_v34, %v421_v38 }
 0x1cf   : > { %v682_v41 = vpop.f32.mrf.mxu1 }
 0x1d0   : > { %v531_v42 = vadd.f32 %v524_v39, %v498_v40 }
 0x1d1   : > { %v424_v43 = vpop.f32.mrf.mxu1 }
 0x1d2   : > { %535 = vst.msk [vmem:[%s242_s28 + $0x8] sm:$0xff] %vm533_vm2, %v531_v42 }
 0x1d3   : > { %v683_v44 = vpop.f32.mrf.mxu1 }
 0x1d5   : > { %v461_v45 = vpop.f32.mrf.mxu1 }
 0x1d6   : > { %v499_v46 = vmul.f32 %v495_v28, %v461_v45 }
 0x1d7   : > { %v688_v48 = vpop.f32.mrf.mxu1 }
 0x1d8   : > { %v532_v49 = vadd.f32 %v528_v47, %v499_v46 }
 0x1d9   : > { %v464_v50 = vpop.f32.mrf.mxu1 }
 0x1da   : > { %536 = vst.msk [vmem:[%s242_s28 + $0x10] sm:$0xff] %vm533_vm2, %v532_v49 }
 0x1db   : > { %v689_v51 = vpop.f32.mrf.mxu1 }
 0x1dc   : > { %794 = shalt.err (!%p791_p10)
}
 0x1dd   : > { %s795_s16 = scalar_lea.hbm %s1033_s6, 384  ;;  %s799_s11 = scalar_lea.hbm %s1082_s5, 768 }
 0x1de   : > { %p796_p0 = scmp.ne.s32.totalorder %s1033_s6, %s795_s16  ;;  %p800_p1 = scmp.lt.s32.totalorder %s1033_s6, %s1082_s5 }
 0x1df   : > { %p801_p3 = scmp.lt.s32.totalorder %s799_s11, %s795_s16 }
 0x1e0   : > { %p797_p2 = pnand %p796_p0, %p1090_p12 }
 0x1e1   : > { %p802_p6 = por %p801_p3, %p800_p1 }
 0x1e2   : > { %p798_p9 = pneg %p797_p2 }
 0x1e4   : > { %p803_p11 = pnand %p802_p6, %p798_p9 }
 0x1e6   : > { %806 = shalt.err (!%p803_p11)
}
 0x1e7   : > { %s854_s15 = smov 128   ;;  %s855_s23 = smov 8  }
 0x1e8   : > { %696 = dma.vmem_to_hbm [thread:$0]  (%p1090_p12), %s1028_s14, 384, %s1033_s6, %s538_s22, %s854_s15, %s854_s15, %s855_s23  }
 0x1e9 PF: > { %s566_s7 = sand.u32 1, %s833_s18   ;;  %p1091_p13 = scmp.ne.s32.totalorder %s1087_s30, 0 }
 0x1ea   : > { %p1092_p4 = scmp.ge.s32.totalorder %s845_s21, 2  ;;  %s567_s8 = scalar_lea.sflag [#allocation4], %s566_s7 }
 0x1ec   : > { %p703_p5 = pnand %p1092_p4, %p1091_p13 }
 0x1ee   : > { %p704_p7 = pneg %p703_p5 }
 0x1f0   : > { %828 = dma.done.wait (%p704_p7), %s567_s8, 384  }
 0x1f1   : > { %830 = vsyncadd (%p704_p7), %s567_s8, 4294966912  ;;  %p18_p8 = scmp.ge.s32.totalorder %s911_s24, 4   ;;  %s1093_s18 = smov %s837_s19 }
 0x1f2   : > { %s1094_s19 = smov %s841_s20  ;;  %s1095_s20 = smov %s923_s27 }
 0x1f3   : > { %s1096_s21 = smov %s911_s24  ;;  %20 = sbr.rel (!%p18_p8) target bundleno = 5 (0x5), region = 85 }
 0x1f8   :  { %572 = vsyncpa [#allocation3], 1 }
 0x1f9   :  { %574 = vsyncpa [#allocation3 + $0x1], 1 }
 0x1fa   :  { %575 = vsyncpa [#allocation4], 1 }
 0x1fb   :  { %577 = vsyncpa [#allocation4 + $0x1], 1 }

</bundles_post_ra>
